<compile_context>
chip_gen: v7x
topology: tpu7x:2x2x1
jax: 0.10.0
libtpu: 0.0.40
codegen_flags: <defaults>
</compile_context>

<pallas_src>
import jax
import jax.numpy as jnp
from jax.experimental import pallas as pl
from jax.experimental.pallas import tpu as pltpu


def _se_gate_mul_kernel(xv_ref, w_ref, feat_ref, out_ref):
    # 1x1 conv on a 1x1 spatial input == matvec. Bias is folded into the last
    # column of W / last row of xv, so no separate bias add.
    logits = jnp.dot(w_ref[...], xv_ref[...],
                     preferred_element_type=jnp.float32)      # (blk, 1) f32
    gate = jax.nn.sigmoid(logits)                             # (blk, 1)
    # Broadcast the gate column across the lane (H*W) axis and scale in place.
    out_ref[...] = (feat_ref[...] * gate).astype(out_ref.dtype)


def se_conv_sigmoid_mul(x221, x218, weight, bias, *, grid_blocks=4):
    """x221: (1, Cin, 1, 1), x218: (1, Cout, H, W), weight: (Cout, Cin, 1, 1)."""
    n, cin, _, _ = x221.shape
    _, cout, h, w = x218.shape
    assert n == 1
    hw = h * w

    assert cout % grid_blocks == 0
    blk = cout // grid_blocks
    assert blk % 8 == 0 or blk == cout  # sublane (8,·) tiling constraint

    # Fold bias into the matvec: W_aug = [W | b] (Cout, Cin+1), xv_aug = [x; 1].
    # bf16 operands, f32 MXU accumulation. Hoistable for static weights.
    wmat = weight.reshape(cout, cin)
    w_aug = jnp.concatenate([wmat, bias.reshape(cout, 1)], axis=1).astype(jnp.bfloat16)
    xv_aug = jnp.concatenate(
        [x221.reshape(cin, 1), jnp.ones((1, 1), dtype=x221.dtype)], axis=0
    ).astype(jnp.bfloat16)

    feat = x218.reshape(cout, hw)          # (Cout, HW) — NCHW-native, free

    f32 = jnp.dtype(jnp.float32).itemsize
    bf16 = jnp.dtype(jnp.bfloat16).itemsize
    cost = pl.CostEstimate(
        flops=2 * (cin + 1) * cout + hw * cout,
        transcendentals=cout,
        bytes_accessed=(2 * cout * hw * f32            # feat read + out write
                        + cout * (cin + 1) * bf16      # W_aug
                        + (cin + 1) * bf16),           # xv_aug
    )

    out_2d = pl.pallas_call(
        _se_gate_mul_kernel,
        out_shape=jax.ShapeDtypeStruct((cout, hw), x218.dtype),
        grid=(grid_blocks,),
        in_specs=[
            pl.BlockSpec((cin + 1, 1), lambda i: (0, 0)),     # xv_aug (resident)
            pl.BlockSpec((blk, cin + 1), lambda i: (i, 0)),   # W_aug block
            pl.BlockSpec((blk, hw), lambda i: (i, 0)),        # feat block
        ],
        out_specs=pl.BlockSpec((blk, hw), lambda i: (i, 0)),
        # feat (arg index 2) is dead after this op -> reuse its HBM buffer.
        # Identity index_map keeps each step's read/write blocks disjoint.
        input_output_aliases={2: 0},
        compiler_params=pltpu.CompilerParams(
            dimension_semantics=("parallel",)),
        cost_estimate=cost,
    )(xv_aug, w_aug, feat)

    # (Cout, HW) -> (1, Cout, H, W): pure reshape, no transpose.
    return out_2d.reshape(1, cout, h, w)


def reference(x221, x218, weight, bias):
    # Pure-JAX f32 reference of the PyTorch module semantics.
    cout, cin = weight.shape[0], weight.shape[1]
    xv = x221.reshape(1, cin)
    logits = xv @ weight.reshape(cout, cin).T + bias[None, :]
    gate = jax.nn.sigmoid(logits).reshape(1, cout, 1, 1)
    return gate * x218


if __name__ == "__main__":
    key = jax.random.PRNGKey(0)
    k1, k2, k3, k4 = jax.random.split(key, 4)

    cin, cout, h, w = 48, 1152, 7, 7
    x221 = jax.random.normal(k1, (1, cin, 1, 1), dtype=jnp.float32)
    x218 = jax.random.normal(k2, (1, cout, h, w), dtype=jnp.float32)
    # Deterministic parameter init (Conv2d(48, 1152, kernel_size=1) shapes).
    weight = jax.random.normal(k3, (cout, cin, 1, 1), dtype=jnp.float32) * 0.05
    bias = jax.random.normal(k4, (cout,), dtype=jnp.float32) * 0.05

    ref = reference(x221, x218, weight, bias)
    out = jax.block_until_ready(se_conv_sigmoid_mul(x221, x218, weight, bias))

    assert out.shape == (1, cout, h, w)
    # bf16 gate-matvec operands loosen the tolerance slightly vs. pure f32.
    assert jnp.allclose(out, ref, atol=1e-2, rtol=1e-2)
    print("KERNEL_OK")
</pallas_src>

<mosaic_0001>
module attributes {stable_mosaic.version = 11 : i64} {
  func.func @_se_gate_mul_kernel(%arg0: i32, %arg1: memref<49x1xbf16, #tpu.memory_space<vmem>>, %arg2: memref<288x49xbf16, #tpu.memory_space<vmem>>, %arg3: memref<288x49xf32, #tpu.memory_space<vmem>>, %arg4: memref<288x49xf32, #tpu.memory_space<vmem>>) attributes {dimension_semantics = [#tpu.dimension_semantics<parallel>], iteration_bounds = array<i64: 4>, scalar_prefetch = 0 : i64, scratch_operands = 0 : i64, tpu.core_type = #tpu.core_type<tc>, window_params = [{pipeline_mode = #tpu.pipeline_mode<synchronous>, transform_indices = @transform_0, window_bounds = array<i64: 49, 1>}, {transform_indices = @transform_1, window_bounds = array<i64: 288, 49>}, {transform_indices = @transform_2, window_bounds = array<i64: 288, 49>}, {transform_indices = @transform_3, window_bounds = array<i64: 288, 49>}]} {
    %c0 = arith.constant 0 : index
    %c0_0 = arith.constant 0 : index
    %0 = vector.load %arg2[%c0, %c0_0] : memref<288x49xbf16, #tpu.memory_space<vmem>>, vector<288x49xbf16>
    %c0_1 = arith.constant 0 : index
    %c0_2 = arith.constant 0 : index
    %1 = vector.load %arg1[%c0_1, %c0_2] : memref<49x1xbf16, #tpu.memory_space<vmem>>, vector<49x1xbf16>
    %cst = arith.constant dense<0.000000e+00> : vector<288x1xf32>
    %2 = tpu.matmul %0, %1, %cst {dimension_numbers = #tpu.dot_dimension_numbers<[1], [0], [0], [1], [0, 0, 1, 1], [], []>} : vector<288x49xbf16>, vector<49x1xbf16>, vector<288x1xf32> -> vector<288x1xf32>
    %3 = arith.negf %2 : vector<288x1xf32>
    %4 = math.exp %3 : vector<288x1xf32>
    %cst_3 = arith.constant 1.000000e+00 : f32
    %5 = vector.broadcast %cst_3 : f32 to vector<288x1xf32>
    %6 = arith.addf %5, %4 : vector<288x1xf32>
    %7 = arith.divf %5, %6 : vector<288x1xf32>
    %c0_4 = arith.constant 0 : index
    %c0_5 = arith.constant 0 : index
    %8 = vector.load %arg3[%c0_4, %c0_5] : memref<288x49xf32, #tpu.memory_space<vmem>>, vector<288x49xf32>
    %9 = vector.broadcast %7 : vector<288x1xf32> to vector<288x49xf32>
    %10 = arith.mulf %8, %9 : vector<288x49xf32>
    %c0_6 = arith.constant 0 : index
    %c0_7 = arith.constant 0 : index
    %11 = vector.load %arg4[%c0_6, %c0_7] : memref<288x49xf32, #tpu.memory_space<vmem>>, vector<288x49xf32>
    tpu.vector_store %arg4[%c0_6, %c0_7], %10 {strides = array<i32>} : memref<288x49xf32, #tpu.memory_space<vmem>>, vector<288x49xf32>,
    return
  }
  func.func @transform_0(%arg0: i32) -> (i32, i32) {
    %c0_i32 = arith.constant 0 : i32
    %c0_i32_0 = arith.constant 0 : i32
    %c0_i32_1 = arith.constant 0 : i32
    return %c0_i32, %c0_i32_0 : i32, i32
  }
  func.func @transform_1(%arg0: i32) -> (i32, i32) {
    %c0_i32 = arith.constant 0 : i32
    %c0_i32_0 = arith.constant 0 : i32
    return %arg0, %c0_i32 : i32, i32
  }
  func.func @transform_2(%arg0: i32) -> (i32, i32) {
    %c0_i32 = arith.constant 0 : i32
    %c0_i32_0 = arith.constant 0 : i32
    return %arg0, %c0_i32 : i32, i32
  }
  func.func @transform_3(%arg0: i32) -> (i32, i32) {
    %c0_i32 = arith.constant 0 : i32
    %c0_i32_0 = arith.constant 0 : i32
    return %arg0, %c0_i32 : i32, i32
  }
}

</mosaic_0001>

<bundles_post_ra>
// kernel: tpu_custom_call.1
= control target key start
LH: loop header
LB: loop body
LE: loop exit
PB: predicated region body
PF: predicated region fallthrough
CT: control target
= control target key end

     0   :  { %s1527_s12 = smov 0   ;;  %s1837_s0 = inlined_call_operand.vmem [shape: bf16[49,1], index: 0, kind: input, shape index: {}]   ;;  %s1838_s1 = inlined_call_operand.vmem [shape: bf16[1152,49], index: 1, kind: input, shape index: {}]   ;;  %s1839_s2 = inlined_call_operand.vmem [shape: f32[1152,49], index: 2, kind: input, shape index: {}, may-alias: {2,3}]   ;;  %s1840_s3 = inlined_call_operand.vmem [shape: f32[1152,49], index: 3, kind: output, shape index: {}, may-alias: {2,3}]  }
   0x1 LB: > { %s1161_s13 = sadd.s32 4294967295, %s1504_s12   ;;  %p1165_p0 = scmp.ge.s32.totalorder %s1504_s12, 1  ;;  %s1504_s12 = sphi %s1527_s12, %s13_s12  }
   0x2   : > { %p149_p1 = scmp.lt.s32.totalorder %s1504_s12, 5 }
   0x4   : > { %p150_p2 = pnand %p1165_p0, %p149_p1 }
   0x5   : > { %v1332_v0 = vld [vmem:[%s1837_s0] sm:$0xff] (!%p150_p2)   ;;  %v1333_v1 = vld [vmem:[%s1837_s0 + $0x8] sm:$0xff] (!%p150_p2)   ;;  %vm406_vm0 = vcmask (!%p150_p2), 1040384   ;;  %s178_s18 = smul.u32 (!%p150_p2), 36, %s1161_s13  ;;  %v1334_v2 = vld [vmem:[%s1837_s0 + $0x10] sm:$0xff] (!%p150_p2)   ;;  %v1506_v4 = vmov (!%p150_p2), 0  }
   0x6   : > { %153 = sbr.rel (%p150_p2) target bundleno = 465 (0x1d1), region = 32  ;;  %1269 = vmatprep.subr.bf16.mxu0 (!%p150_p2), %v1332_v0  ;;  %1313 = vmatprep.subr.bf16.mxu1 (!%p150_p2), %v1332_v0  ;;  %v1335_v3 = vld [vmem:[%s1837_s0 + $0x18] ss:$0 sps:$4 sm:$0x11] (!%p150_p2)   ;;  %v408_v5 = vsel (!%p150_p2), %vm406_vm0, 65535, %v1506_v4  ;;  %vm351_vm1 = vcmask (!%p150_p2), 400384  }
   0x7   : > { %1270 = vmatpush3.bf16.msra.mxu0 (!%p150_p2), %v1332_v0  ;;  %1317 = vmatpush3.bf16.msra.mxu1 (!%p150_p2), %v1332_v0  ;;  %p179_p3 = scmp.lt.s32.totalorder (!%p150_p2), %s178_s18, 143  ;;  %v410_v6 = vand.u32 (!%p150_p2), %v1335_v3, %v408_v5 }
   0x8   : > { %1271 = vmatprep.subr.bf16.mxu0 (!%p150_p2), %v1333_v1  ;;  %1314 = vmatprep.subr.bf16.mxu1 (!%p150_p2), %v1333_v1 }
   0x9   : > { %1331 = vset.pattern.permute.xlu0 (!%p150_p2), %v1506_v4  ;;  %1330 = vset.pattern.permute.xlu1 (!%p150_p2), %v1506_v4 }
   0xb   : > { %1272 = vmatpush3.bf16.msra.mxu0 (!%p150_p2), %v1333_v1  ;;  %1318 = vmatpush3.bf16.msra.mxu1 (!%p150_p2), %v1333_v1 }
   0xc   : > { %1273 = vmatprep.subr.bf16.mxu0 (!%p150_p2), %v1334_v2  ;;  %1315 = vmatprep.subr.bf16.mxu1 (!%p150_p2), %v1334_v2 }
   0xd   : > { %s1842_s18 = smov (!%p179_p3, %s178_s18), 143 }
   0xe   : > { %s1166_s23 = sshll.u32 %s1842_s18, 2  ;;  %s1167_s27 = sshll.u32 %s1842_s18, 3 }
   0xf   : > { %s1553_s26 = scalar_lea.vmem %s1838_s1, %s1166_s23  ;;  %1274 = vmatpush3.bf16.msra.mxu0 %v1334_v2  ;;  %1319 = vmatpush3.bf16.msra.mxu1 %v1334_v2  ;;  %s1651_s30 = scalar_lea.vmem %s1839_s2, %s1167_s27 }
  0x10   : > { %v1336_v7 = vld [vmem:[%s1553_s26] sm:$0xff]   ;;  %1275 = vmatprep.subr.bf16.mxu0 %v410_v6  ;;  %1316 = vmatprep.subr.bf16.mxu1 %v410_v6  ;;  %v1337_v8 = vld [vmem:[%s1553_s26 + $0x50] sm:$0xff]   ;;  %v1338_v9 = vld [vmem:[%s1553_s26 + $0x8] sm:$0xff]   ;;  %s1729_s6 = scalar_lea.vmem %s1840_s3, %s1167_s27 }
  0x11   : > { %1277 = vmatprep.mubr.msk.bf16.mxu0 %vm351_vm1, %v1336_v7  ;;  %1297 = vmatprep.mubr.msk.bf16.mxu1 %vm351_vm1, %v1337_v8  ;;  %v1339_v10 = vld [vmem:[%s1553_s26 + $0x58] sm:$0xff]   ;;  %v1340_v11 = vld [vmem:[%s1553_s26 + $0x10] sm:$0xff]   ;;  %v1342_v12 = vld [vmem:[%s1553_s26 + $0x60] sm:$0xff]  }
  0x12   : > { %v1341_v13 = vld [vmem:[%s1553_s26 + $0x18] sm:$0xff]   ;;  %v1343_v14 = vld [vmem:[%s1553_s26 + $0x68] sm:$0xff]   ;;  %v1344_v15 = vld [vmem:[%s1553_s26 + $0x20] sm:$0xff]  }
  0x13   : > { %1276 = vmatpush3.bf16.msra.mxu0 %v410_v6  ;;  %1320 = vmatpush3.bf16.msra.mxu1 %v410_v6  ;;  %v1346_v16 = vld [vmem:[%s1553_s26 + $0x70] sm:$0xff]   ;;  %v1345_v17 = vld [vmem:[%s1553_s26 + $0x28] sm:$0xff]   ;;  %v1347_v18 = vld [vmem:[%s1553_s26 + $0x78] sm:$0xff]  }
  0x14   : > { %v1348_v19 = vld [vmem:[%s1553_s26 + $0x30] sm:$0xff]   ;;  %v1350_v20 = vld [vmem:[%s1553_s26 + $0x80] sm:$0xff]   ;;  %v1349_v21 = vld [vmem:[%s1553_s26 + $0x38] sm:$0xff]  }
  0x15   : > { %v1351_v22 = vld [vmem:[%s1553_s26 + $0x88] sm:$0xff]   ;;  %v1352_v23 = vld [vmem:[%s1553_s26 + $0x40] sm:$0xff]  }
  0x16   : > { %1278 = vmatmul.mubr.msk.bf16.vlgmr.msra.gmra.mrb[0].mxu0 %vm351_vm1, %v1338_v9  ;;  %1298 = vmatmul.mubr.msk.bf16.vlgmr.msra.gmra.mrb[0].mxu1 %vm351_vm1, %v1339_v10  ;;  %v1353_v24 = vld [vmem:[%s1553_s26 + $0x48] sm:$0xff]  }
  0x17   : > { %1281 = vmatprep.mubr.msk.bf16.mxu0 %vm351_vm1, %v1340_v11  ;;  %1301 = vmatprep.mubr.msk.bf16.mxu1 %vm351_vm1, %v1342_v12 }
  0x1e   : > { %1282 = vmatmul.mubr.msk.bf16.gmra.mrb[4].mxu0 %vm351_vm1, %v1341_v13  ;;  %1302 = vmatmul.mubr.msk.bf16.gmra.mrb[4].mxu1 %vm351_vm1, %v1343_v14 }
  0x1f   : > { %1285 = vmatprep.mubr.msk.bf16.mxu0 %vm351_vm1, %v1344_v15  ;;  %1305 = vmatprep.mubr.msk.bf16.mxu1 %vm351_vm1, %v1346_v16 }
  0x26   : > { %1286 = vmatmul.mubr.msk.bf16.gmra.mrb[8].mxu0 %vm351_vm1, %v1345_v17  ;;  %1306 = vmatmul.mubr.msk.bf16.gmra.mrb[8].mxu1 %vm351_vm1, %v1347_v18 }
  0x27   : > { %1289 = vmatprep.mubr.msk.bf16.mxu0 %vm351_vm1, %v1348_v19  ;;  %1309 = vmatprep.mubr.msk.bf16.mxu1 %vm351_vm1, %v1350_v20 }
  0x2e   : > { %1290 = vmatmul.mubr.msk.bf16.gmra.mrb[12].mxu0 %vm351_vm1, %v1349_v21  ;;  %1310 = vmatmul.mubr.msk.bf16.gmra.mrb[12].mxu1 %vm351_vm1, %v1351_v22 }
  0x2f   : > { %1293 = vmatprep.mubr.msk.bf16.mxu0 %vm351_vm1, %v1352_v23 }
  0x36   : > { %1294 = vmatmul.mubr.msk.bf16.gmra.mrb[16].mxu0 %vm351_vm1, %v1353_v24 }
  0xe9   : > { %v1279_v25 = vpop.f32.mrb[0].mxu0  ;;  %v1299_v26 = vpop.f32.mrb[0].mxu1 }
  0xea   : > { %v1211_v27 = vmul.f32 -1.442695, %v1279_v25  ;;  %v1231_v28 = vmul.f32 -1.442695, %v1299_v26  ;;  %v446_v29 = vpop.f32.mrb[1].mxu0  ;;  %v526_v30 = vpop.f32.mrb[1].mxu1 }
  0xeb   : > { %v1209_v31 = vmul.f32 -1.442695, %v446_v29  ;;  %v1229_v32 = vmul.f32 -1.442695, %v526_v30  ;;  %v1280_v33 = vpop.f32.mrb[2].mxu0  ;;  %v1300_v34 = vpop.f32.mrb[2].mxu1 }
  0xec   : > { %1354 = vpow2.f32 %v1211_v27  ;;  %v1212_v35 = vmul.f32 -1.442695, %v1280_v33  ;;  %v449_v36 = vpop.f32.mrb[3].mxu0  ;;  %v529_v37 = vpop.f32.mrb[3].mxu1  ;;  %v1232_v38 = vmul.f32 -1.442695, %v1300_v34 }
  0xed   : > { %1356 = vpow2.f32 %v1231_v28  ;;  %v1210_v39 = vmul.f32 -1.442695, %v449_v36  ;;  %v1230_v40 = vmul.f32 -1.442695, %v529_v37 }
  0xee   : > { %1358 = vpow2.f32 %v1209_v31 }
  0xef   : > { %1360 = vpow2.f32 %v1229_v32 }
  0xf0   : > { %1362 = vpow2.f32 %v1212_v35 }
  0xf1   : > { %1364 = vpow2.f32 %v1232_v38  ;;  %v1283_v41 = vpop.f32.mrb[4].mxu0  ;;  %v1303_v42 = vpop.f32.mrb[4].mxu1 }
  0xf2   : > { %v462_v43 = vpop.f32.mrb[5].mxu0  ;;  %v542_v44 = vpop.f32.mrb[5].mxu1  ;;  %1366 = vpow2.f32 %v1210_v39  ;;  %v1215_v47 = vmul.f32 -1.442695, %v1283_v41  ;;  %v1235_v54 = vmul.f32 -1.442695, %v1303_v42 }
  0xf3   : > { %v1284_v45 = vpop.f32.mrb[6].mxu0  ;;  %v1304_v46 = vpop.f32.mrb[6].mxu1  ;;  %1368 = vpow2.f32 %v1230_v40  ;;  %v1213_v3 = vmul.f32 -1.442695, %v462_v43  ;;  %v1233_v18 = vmul.f32 -1.442695, %v542_v44 }
  0xf4   : > { %v1216_v48 = vmul.f32 -1.442695, %v1284_v45  ;;  %v465_v49 = vpop.f32.mrb[7].mxu0  ;;  %v1591_v50 = vpop.f32.mrb[7].mxu1  ;;  %v1236_v21 = vmul.f32 -1.442695, %v1304_v46 }
  0xf5   : > { %v1214_v11 = vmul.f32 -1.442695, %v465_v49  ;;  %v1234_v33 = vmul.f32 -1.442695, %v1591_v50 }
  0xf6   : > { %v1355_v51 = vpop.eup %1354  ;;  %1370 = vpow2.f32 %v1216_v48 }
  0xf7   : > { %v1357_v52 = vpop.eup %1356  ;;  %v699_v53 = vadd.f32 1.0, %v1355_v51  ;;  %1372 = vpow2.f32 %v1215_v47 }
  0xf8   : > { %v1359_v55 = vpop.eup %1358  ;;  %v719_v56 = vadd.f32 1.0, %v1357_v52 }
  0xf9   : > { %v1361_v57 = vpop.eup %1360  ;;  %1374 = vrcp.f32 %v699_v53  ;;  %v1287_v58 = vpop.f32.mrb[8].mxu0  ;;  %v697_v61 = vadd.f32 1.0, %v1359_v55 }
  0xfa   : > { %v1307_v59 = vpop.f32.mrb[8].mxu1  ;;  %v1363_v60 = vpop.eup %1362  ;;  %1376 = vrcp.f32 %v719_v56  ;;  %v717_v9 = vadd.f32 1.0, %v1361_v57  ;;  %v1219_v29 = vmul.f32 -1.442695, %v1287_v58 }
  0xfb   : > { %v1593_v62 = vpop.f32.mrb[9].mxu0  ;;  %v1365_v63 = vpop.eup %1364  ;;  %v700_v0 = vadd.f32 1.0, %v1363_v60  ;;  %1378 = vpow2.f32 %v1235_v54  ;;  %v1239_v36 = vmul.f32 -1.442695, %v1307_v59 }
  0xfc   : > { %v1288_v1 = vpop.f32.mrb[10].mxu0  ;;  %v1595_v2 = vpop.f32.mrb[9].mxu1  ;;  %v720_v6 = vadd.f32 1.0, %v1365_v63  ;;  %v1217_v44 = vmul.f32 -1.442695, %v1593_v62 }
  0xfd   : > { %v1597_v4 = vpop.f32.mrb[11].mxu0  ;;  %v1367_v5 = vpop.eup %1366  ;;  %1380 = vrcp.f32 %v700_v0  ;;  %v1220_v39 = vmul.f32 -1.442695, %v1288_v1  ;;  %v1237_v49 = vmul.f32 -1.442695, %v1595_v2 }
  0xfe   : > { %v1599_v7 = vpop.f32.mrb[10].mxu1  ;;  %v1369_v8 = vpop.eup %1368  ;;  %1382 = vrcp.f32 %v697_v61  ;;  %v698_v12 = vadd.f32 1.0, %v1367_v5  ;;  %v1218_v58 = vmul.f32 -1.442695, %v1597_v4 }
  0xff   : > { %v1601_v10 = vpop.f32.mrb[11].mxu1  ;;  %1384 = vpow2.f32 %v1213_v3  ;;  %v718_v14 = vadd.f32 1.0, %v1369_v8  ;;  %v1240_v51 = vmul.f32 -1.442695, %v1599_v7 }
 0x100   : > { %v1371_v13 = vpop.eup %1370  ;;  %1386 = vrcp.f32 %v720_v6  ;;  %v1238_v2 = vmul.f32 -1.442695, %v1601_v10 }
 0x101   : > { %v1603_v15 = vpop.f32.mrb[12].mxu0  ;;  %v1605_v16 = vpop.f32.mrb[12].mxu1  ;;  %1388 = vrcp.f32 %v717_v9  ;;  %v704_v25 = vadd.f32 1.0, %v1371_v13 }
 0x102   : > { %v1373_v17 = vpop.eup %1372  ;;  %v1607_v19 = vpop.f32.mrb[13].mxu0  ;;  %1390 = vpow2.f32 %v1214_v11  ;;  %v1223_v62 = vmul.f32 -1.442695, %v1603_v15 }
 0x103   : > { %v1375_v20 = vpop.eup %1374  ;;  %v1609_v22 = vpop.f32.mrb[14].mxu0  ;;  %1392 = vrcp.f32 %v698_v12  ;;  %v703_v31 = vadd.f32 1.0, %v1373_v17  ;;  %v1221_v4 = vmul.f32 -1.442695, %v1607_v19 }
 0x104   : > { %v1611_v23 = vpop.f32.mrb[13].mxu1  ;;  %v1377_v24 = vpop.eup %1376  ;;  %853 = vperm.xlu1 %1330, %v1375_v20   ;;  %1394 = vrcp.f32 %v718_v14  ;;  %v1224_v12 = vmul.f32 -1.442695, %v1609_v22 }
 0x105   : > { %v1613_v26 = vpop.f32.mrb[15].mxu0  ;;  %v1615_v27 = vpop.f32.mrb[14].mxu1  ;;  %953 = vperm.xlu0 %1331, %v1377_v24   ;;  %1396 = vpow2.f32 %v1233_v18  ;;  %v1241_v17 = vmul.f32 -1.442695, %v1611_v23 }
 0x106   : > { %v1379_v28 = vpop.eup %1378  ;;  %v1617_v30 = vpop.f32.mrb[15].mxu1  ;;  %1398 = vpow2.f32 %v1236_v21  ;;  %v1222_v15 = vmul.f32 -1.442695, %v1613_v26 }
 0x107   : > { %v1381_v32 = vpop.eup %1380  ;;  %1400 = vrcp.f32 %v704_v25  ;;  %v723_v35 = vadd.f32 1.0, %v1379_v28  ;;  %v1242_v26 = vmul.f32 -1.442695, %v1617_v30 }
 0x108   : > { %v1383_v34 = vpop.eup %1382  ;;  %858 = vperm.xlu1 %1330, %v1381_v32   ;;  %1402 = vpow2.f32 %v1219_v29 }
 0x109   : > { %843 = vperm.xlu0 %1331, %v1383_v34   ;;  %v1620_v37 = vpop.f32.mrb[16].mxu0  ;;  %v1385_v38 = vpop.eup %1384  ;;  %1404 = vrcp.f32 %v703_v31 }
 0x10a   : > { %v1622_v40 = vpop.f32.mrb[17].mxu0  ;;  %v1387_v41 = vpop.eup %1386  ;;  %1406 = vpow2.f32 %v1234_v33  ;;  %v701_v47 = vadd.f32 1.0, %v1385_v38  ;;  %v1227_v24 = vmul.f32 -1.442695, %v1620_v37  ;;  %v1243_v38 = vmul.f32 -1.442695, %v1605_v16 }
 0x10b   : > { %v1624_v42 = vpop.f32.mrb[18].mxu0  ;;  %v1389_v43 = vpop.eup %1388  ;;  %1408 = vrcp.f32 %v723_v35  ;;  %v1225_v31 = vmul.f32 -1.442695, %v1622_v40 }
 0x10c   : > { %958 = vperm.xlu1 %1330, %v1387_v41   ;;  %v1627_v45 = vpop.f32.mrb[19].mxu0  ;;  %v1391_v46 = vpop.eup %1390  ;;  %1410 = vpow2.f32 %v1239_v36  ;;  %v1228_v35 = vmul.f32 -1.442695, %v1624_v42 }
 0x10d   : > { %943 = vperm.xlu0 %1331, %v1389_v43   ;;  %v1393_v48 = vpop.eup %1392  ;;  %1412 = vpow2.f32 %v1220_v39  ;;  %v702_v60 = vadd.f32 1.0, %v1391_v46  ;;  %v1226_v43 = vmul.f32 -1.442695, %v1627_v45 }
 0x10e   : > { %v1395_v50 = vpop.eup %1394  ;;  %1414 = vpow2.f32 %v1217_v44 }
 0x10f   : > { %v1397_v52 = vpop.eup %1396  ;;  %1416 = vrcp.f32 %v701_v47 }
 0x110   : > { %948 = vperm.xlu1 %1330, %v1395_v50   ;;  %v1399_v53 = vpop.eup %1398  ;;  %v721_v55 = vadd.f32 1.0, %v1397_v52  ;;  %1418 = vpow2.f32 %v1237_v49  ;;  %v1244_v49 = vmul.f32 -1.442695, %v1615_v27 }
 0x111   : > { %848 = vperm.xlu0 %1331, %v1393_v48   ;;  %v1401_v54 = vpop.eup %1400  ;;  %v724_v56 = vadd.f32 1.0, %v1399_v53  ;;  %1420 = vpow2.f32 %v1240_v51 }
 0x112   : > { %v1403_v57 = vpop.eup %1402 }
 0x113   : > { %v1405_v59 = vpop.eup %1404  ;;  %1422 = vrcp.f32 %v724_v56  ;;  %v707_v0 = vadd.f32 1.0, %v1403_v57 }
 0x114   : > { %878 = vperm.xlu1 %1330, %v1401_v54   ;;  %v1407_v61 = vpop.eup %1406  ;;  %1424 = vrcp.f32 %v721_v55 }
 0x115   : > { %873 = vperm.xlu0 %1331, %v1405_v59   ;;  %v1409_v63 = vpop.eup %1408  ;;  %1426 = vpow2.f32 %v1218_v58  ;;  %v722_v5 = vadd.f32 1.0, %v1407_v61 }
 0x116   : > { %v1411_v1 = vpop.eup %1410  ;;  %1428 = vrcp.f32 %v702_v60 }
 0x117   : > { %v1413_v3 = vpop.eup %1412  ;;  %1430 = vpow2.f32 %v1223_v62  ;;  %v727_v7 = vadd.f32 1.0, %v1411_v1 }
 0x118   : > { %v1415_v6 = vpop.eup %1414  ;;  %1432 = vrcp.f32 %v707_v0  ;;  %v708_v9 = vadd.f32 1.0, %v1413_v3 }
 0x119   : > { %973 = vperm.xlu0 %1331, %v1409_v63   ;;  %v1417_v8 = vpop.eup %1416  ;;  %1434 = vpow2.f32 %v1238_v2  ;;  %v705_v14 = vadd.f32 1.0, %v1415_v6 }
 0x11a   : > { %v1419_v11 = vpop.eup %1418  ;;  %1436 = vrcp.f32 %v722_v5 }
 0x11b   : > { %v1421_v13 = vpop.eup %1420  ;;  %1438 = vpow2.f32 %v1221_v4  ;;  %v725_v21 = vadd.f32 1.0, %v1419_v11 }
 0x11c   : > { %1440 = vrcp.f32 %v727_v7  ;;  %v728_v19 = vadd.f32 1.0, %v1421_v13 }
 0x11d   : > { %863 = vperm.xlu0 %1331, %v1417_v8   ;;  %v1423_v10 = vpop.eup %1422  ;;  %1442 = vrcp.f32 %v708_v9 }
 0x11e   : > { %978 = vperm.xlu1 %1330, %v1423_v10   ;;  %v1425_v18 = vpop.eup %1424  ;;  %1444 = vpow2.f32 %v1224_v12  ;;  %v807_v10 = vld [vmem:[%s1651_s30 + $0x10] sm:$0xff] }
 0x11f   : > { %v1427_v20 = vpop.eup %1426  ;;  %1446 = vrcp.f32 %v705_v14  ;;  %v827_v14 = vld [vmem:[%s1651_s30 + $0xb0] sm:$0xff] }
 0x120   : > { %v1429_v22 = vpop.eup %1428  ;;  %1448 = vpow2.f32 %v1222_v15  ;;  %v706_v29 = vadd.f32 1.0, %v1427_v20  ;;  %v805_v15 = vld [vmem:[%s1651_s30] sm:$0xff]  ;;  %v826_v20 = vld [vmem:[%s1651_s30 + $0xa8] sm:$0xff] }
 0x121   : > { %963 = vperm.xlu0 %1331, %v1425_v18   ;;  %v1431_v25 = vpop.eup %1430  ;;  %1450 = vpow2.f32 %v1241_v17  ;;  %v808_v17 = vld [vmem:[%s1651_s30 + $0x18] sm:$0xff]  ;;  %v825_v18 = vld [vmem:[%s1651_s30 + $0xa0] sm:$0xff] }
 0x122   : > { %868 = vperm.xlu1 %1330, %v1429_v22   ;;  %v1433_v28 = vpop.eup %1432  ;;  %1452 = vrcp.f32 %v728_v19  ;;  %v711_v33 = vadd.f32 1.0, %v1431_v25  ;;  %v828_v19 = vld [vmem:[%s1651_s30 + $0xb8] sm:$0xff]  ;;  %v811_v22 = vld [vmem:[%s1651_s30 + $0x30] sm:$0xff] }
 0x123   : > { %v1435_v23 = vpop.eup %1434  ;;  %1454 = vrcp.f32 %v725_v21  ;;  %v806_v21 = vld [vmem:[%s1651_s30 + $0x8] sm:$0xff]  ;;  %v831_v25 = vld [vmem:[%s1651_s30 + $0xd0] sm:$0xff] }
 0x124   : > { %v1437_v32 = vpop.eup %1436  ;;  %1456 = vpow2.f32 %v1227_v24  ;;  %v726_v37 = vadd.f32 1.0, %v1435_v23  ;;  %v812_v24 = vld [vmem:[%s1651_s30 + $0x38] sm:$0xff]  ;;  %v829_v23 = vld [vmem:[%s1651_s30 + $0xc0] sm:$0xff] }
 0x125   : > { %893 = vperm.xlu0 %1331, %v1433_v28   ;;  %v1439_v34 = vpop.eup %1438  ;;  %1458 = vpow2.f32 %v1242_v26  ;;  %v832_v26 = vld [vmem:[%s1651_s30 + $0xd8] sm:$0xff]  ;;  %v809_v28 = vld [vmem:[%s1651_s30 + $0x20] sm:$0xff] }
 0x126   : > { %968 = vperm.xlu1 %1330, %v1437_v32   ;;  %v1441_v36 = vpop.eup %1440  ;;  %1460 = vrcp.f32 %v706_v29  ;;  %v709_v40 = vadd.f32 1.0, %v1439_v34  ;;  %v1667_v29 = vld [vmem:[%s1651_s30 + $0x28] sm:$0xff]  ;;  %v1674_v32 = vld [vmem:[%s1651_s30 + $0x50] sm:$0xff] }
 0x127   : > { %v1443_v30 = vpop.eup %1442  ;;  %1462 = vpow2.f32 %v1225_v31  ;;  %v1671_v31 = vld [vmem:[%s1651_s30 + $0xc8] sm:$0xff]  ;;  %v1680_v34 = vld [vmem:[%s1651_s30 + $0xf0] sm:$0xff] }
 0x128   : > { %v1445_v39 = vpop.eup %1444  ;;  %1464 = vrcp.f32 %v711_v33  ;;  %v1677_v33 = vld [vmem:[%s1651_s30 + $0x58] sm:$0xff] }
 0x129   : > { %993 = vperm.xlu0 %1331, %v1441_v36   ;;  %v1447_v41 = vpop.eup %1446  ;;  %1466 = vpow2.f32 %v1228_v35  ;;  %v712_v46 = vadd.f32 1.0, %v1445_v39  ;;  %v1683_v35 = vld [vmem:[%s1651_s30 + $0xf8] sm:$0xff]  ;;  %v1686_v36 = vld [vmem:[%s1651_s30 + $0x40] sm:$0xff]  ;;  %v1698_v39 = vld [vmem:[%s1651_s30 + $0x70] sm:$0xff] }
 0x12a   : > { %898 = vperm.xlu1 %1330, %v1443_v30   ;;  %v1449_v44 = vpop.eup %1448  ;;  %1468 = vrcp.f32 %v726_v37  ;;  %v1689_v37 = vld [vmem:[%s1651_s30 + $0x48] sm:$0xff]  ;;  %v1692_v30 = vld [vmem:[%s1651_s30 + $0xe0] sm:$0xff] }
 0x12b   : > { %v1451_v42 = vpop.eup %1450  ;;  %1470 = vpow2.f32 %v1243_v38  ;;  %v710_v51 = vadd.f32 1.0, %v1449_v44  ;;  %v1695_v38 = vld [vmem:[%s1651_s30 + $0xe8] sm:$0xff]  ;;  %v1710_v44 = vld [vmem:[%s1651_s30 + $0x100] sm:$0xff] }
 0x12c   : > { %v1453_v47 = vpop.eup %1452  ;;  %1472 = vrcp.f32 %v709_v40  ;;  %v729_v48 = vadd.f32 1.0, %v1451_v42  ;;  %v1701_v40 = vld [vmem:[%s1651_s30 + $0x78] sm:$0xff]  ;;  %v1716_v42 = vld [vmem:[%s1651_s30 + $0x90] sm:$0xff] }
 0x12d   : > { %883 = vperm.xlu0 %1331, %v1447_v41   ;;  %v1455_v16 = vpop.eup %1454  ;;  %1474 = vpow2.f32 %v1226_v43  ;;  %v1704_v41 = vld [vmem:[%s1651_s30 + $0x60] sm:$0xff]  ;;  %v1707_v43 = vld [vmem:[%s1651_s30 + $0x68] sm:$0xff] }
 0x12e   : > { %998 = vperm.xlu1 %1330, %v1453_v47   ;;  %v1457_v50 = vpop.eup %1456  ;;  %1476 = vrcp.f32 %v712_v46  ;;  %v1713_v46 = vld [vmem:[%s1651_s30 + $0x108] sm:$0xff]  ;;  %v1719_v47 = vld [vmem:[%s1651_s30 + $0x98] sm:$0xff] }
 0x12f   : > { %v1459_v52 = vpop.eup %1458  ;;  %1478 = vrcp.f32 %v729_v48  ;;  %v715_v53 = vadd.f32 1.0, %v1457_v50  ;;  %v1722_v48 = vld [vmem:[%s1651_s30 + $0x80] sm:$0xff]  ;;  %v1735_v50 = vld [vmem:[%s1651_s30 + $0x110] sm:$0xff] }
 0x130   : > { %v1461_v45 = vpop.eup %1460  ;;  %1480 = vpow2.f32 %v1244_v49  ;;  %v730_v56 = vadd.f32 1.0, %v1459_v52  ;;  %v1732_v49 = vld [vmem:[%s1651_s30 + $0x88] sm:$0xff] }
 0x131   : > { %983 = vperm.xlu0 %1331, %v1455_v16   ;;  %v1463_v54 = vpop.eup %1462  ;;  %1482 = vrcp.f32 %v710_v51  ;;  %v1738_v51 = vld [vmem:[%s1651_s30 + $0x118] sm:$0xff] }
 0x132   : > { %888 = vperm.xlu1 %1330, %v1461_v45   ;;  %v1465_v55 = vpop.eup %1464  ;;  %1484 = vrcp.f32 %v715_v53  ;;  %v713_v27 = vadd.f32 1.0, %v1463_v54 }
 0x133   : > { %v1467_v57 = vpop.eup %1466  ;;  %1486 = vrcp.f32 %v730_v56 }
 0x134   : > { %v1469_v58 = vpop.eup %1468  ;;  %v716_v61 = vadd.f32 1.0, %v1467_v57  ;;  %1488 = vrcp.f32 %v713_v27 }
 0x135   : > { %913 = vperm.xlu0 %1331, %v1465_v55   ;;  %v1471_v59 = vpop.eup %1470 }
 0x136   : > { %988 = vperm.xlu1 %1330, %v1469_v58   ;;  %v1473_v60 = vpop.eup %1472  ;;  %v731_v0 = vadd.f32 1.0, %v1471_v59  ;;  %1490 = vrcp.f32 %v716_v61 }
 0x137   : > { %v1475_v62 = vpop.eup %1474 }
 0x138   : > { %v1477_v63 = vpop.eup %1476  ;;  %v714_v2 = vadd.f32 1.0, %v1475_v62  ;;  %1492 = vrcp.f32 %v731_v0 }
 0x139   : > { %903 = vperm.xlu0 %1331, %v1473_v60   ;;  %v1479_v1 = vpop.eup %1478 }
 0x13a   : > { %918 = vperm.xlu1 %1330, %v1477_v63   ;;  %v1481_v3 = vpop.eup %1480  ;;  %1494 = vrcp.f32 %v714_v2 }
 0x13b   : > { %v1483_v5 = vpop.eup %1482  ;;  %v732_v6 = vadd.f32 1.0, %v1481_v3 }
 0x13c   : > { %v1485_v4 = vpop.eup %1484 }
 0x13d   : > { %1003 = vperm.xlu0 %1331, %v1479_v1   ;;  %v1487_v7 = vpop.eup %1486  ;;  %1496 = vrcp.f32 %v732_v6 }
 0x13e   : > { %908 = vperm.xlu1 %1330, %v1483_v5   ;;  %v1489_v8 = vpop.eup %1488 }
 0x140   : > { %v1491_v9 = vpop.eup %1490 }
 0x141   : > { %933 = vperm.xlu0 %1331, %v1485_v4  }
 0x142   : > { %1008 = vperm.xlu1 %1330, %v1487_v7   ;;  %v1493_v11 = vpop.eup %1492 }
 0x144   : > { %v1495_v12 = vpop.eup %1494 }
 0x145   : > { %923 = vperm.xlu0 %1331, %v1489_v8  }
 0x146   : > { %938 = vperm.xlu1 %1330, %v1491_v9  }
 0x147   : > { %v1497_v13 = vpop.eup %1496 }
 0x149   : > { %1013 = vperm.xlu0 %1331, %v1493_v11  }
 0x14a   : > { %928 = vperm.xlu1 %1330, %v1495_v12  }
 0x14e   : > { %1018 = vperm.xlu1 %1330, %v1497_v13  }
 0x183   : > { %v854_v16 = vpop.permute.xlu1 %853 }
 0x184   : > { %v954_v52 = vpop.permute.xlu0 %953  ;;  %v1023_v45 = vmul.f32 %v854_v16, %v807_v10 }
 0x185   : > { %v1043_v53 = vmul.f32 %v954_v52, %v827_v14 }
 0x186   : > { %1059 = vst.msk [vmem:[%s1729_s6 + $0x10] sm:$0xff] %vm351_vm1, %v1023_v45 }
 0x187   : > { %v859_v54 = vpop.permute.xlu1 %858  ;;  %1079 = vst.msk [vmem:[%s1729_s6 + $0xb0] sm:$0xff] %vm351_vm1, %v1043_v53 }
 0x188   : > { %v844_v55 = vpop.permute.xlu0 %843  ;;  %v1024_v56 = vmul.f32 %v859_v54, %v808_v17 }
 0x189   : > { %v1021_v57 = vmul.f32 %v844_v55, %v805_v15 }
 0x18a   : > { %1060 = vst.msk [vmem:[%s1729_s6 + $0x18] sm:$0xff] %vm351_vm1, %v1024_v56 }
 0x18b   : > { %v959_v58 = vpop.permute.xlu1 %958  ;;  %1057 = vst.msk [vmem:[%s1729_s6] sm:$0xff] %vm351_vm1, %v1021_v57 }
 0x18c   : > { %v944_v27 = vpop.permute.xlu0 %943  ;;  %v1044_v59 = vmul.f32 %v959_v58, %v828_v19 }
 0x18d   : > { %v1041_v60 = vmul.f32 %v944_v27, %v825_v18 }
 0x18e   : > { %1080 = vst.msk [vmem:[%s1729_s6 + $0xb8] sm:$0xff] %vm351_vm1, %v1044_v59 }
 0x18f   : > { %v949_v61 = vpop.permute.xlu1 %948  ;;  %1077 = vst.msk [vmem:[%s1729_s6 + $0xa0] sm:$0xff] %vm351_vm1, %v1041_v60 }
 0x190   : > { %v1042_v62 = vmul.f32 %v949_v61, %v826_v20  ;;  %v849_v63 = vpop.permute.xlu0 %848 }
 0x191   : > { %v1022_v0 = vmul.f32 %v849_v63, %v806_v21 }
 0x192   : > { %1078 = vst.msk [vmem:[%s1729_s6 + $0xa8] sm:$0xff] %vm351_vm1, %v1042_v62 }
 0x193   : > { %v879_v1 = vpop.permute.xlu1 %878  ;;  %1058 = vst.msk [vmem:[%s1729_s6 + $0x8] sm:$0xff] %vm351_vm1, %v1022_v0 }
 0x194   : > { %v874_v2 = vpop.permute.xlu0 %873  ;;  %v1028_v3 = vmul.f32 %v879_v1, %v812_v24 }
 0x195   : > { %v1027_v5 = vmul.f32 %v874_v2, %v811_v22 }
 0x196   : > { %1064 = vst.msk [vmem:[%s1729_s6 + $0x38] sm:$0xff] %vm351_vm1, %v1028_v3 }
 0x197   : > { %1063 = vst.msk [vmem:[%s1729_s6 + $0x30] sm:$0xff] %vm351_vm1, %v1027_v5 }
 0x198   : > { %v974_v4 = vpop.permute.xlu0 %973 }
 0x199   : > { %v1047_v6 = vmul.f32 %v974_v4, %v831_v25 }
 0x19b   : > { %1083 = vst.msk [vmem:[%s1729_s6 + $0xd0] sm:$0xff] %vm351_vm1, %v1047_v6 }
 0x19c   : > { %v864_v7 = vpop.permute.xlu0 %863 }
 0x19d   : > { %v1025_v8 = vmul.f32 %v864_v7, %v809_v28  ;;  %v979_v9 = vpop.permute.xlu1 %978 }
 0x19e   : > { %v1048_v11 = vmul.f32 %v979_v9, %v832_v26 }
 0x19f   : > { %1061 = vst.msk [vmem:[%s1729_s6 + $0x20] sm:$0xff] %vm351_vm1, %v1025_v8 }
 0x1a0   : > { %v964_v12 = vpop.permute.xlu0 %963  ;;  %1084 = vst.msk [vmem:[%s1729_s6 + $0xd8] sm:$0xff] %vm351_vm1, %v1048_v11 }
 0x1a1   : > { %v1045_v13 = vmul.f32 %v964_v12, %v829_v23  ;;  %v869_v14 = vpop.permute.xlu1 %868 }
 0x1a2   : > { %v1026_v10 = vmul.f32 %v869_v14, %v1667_v29 }
 0x1a3   : > { %1081 = vst.msk [vmem:[%s1729_s6 + $0xc0] sm:$0xff] %vm351_vm1, %v1045_v13 }
 0x1a4   : > { %v894_v15 = vpop.permute.xlu0 %893  ;;  %1062 = vst.msk [vmem:[%s1729_s6 + $0x28] sm:$0xff] %vm351_vm1, %v1026_v10 }
 0x1a5   : > { %v1031_v17 = vmul.f32 %v894_v15, %v1674_v32  ;;  %v969_v18 = vpop.permute.xlu1 %968 }
 0x1a6   : > { %v1046_v19 = vmul.f32 %v969_v18, %v1671_v31 }
 0x1a7   : > { %1067 = vst.msk [vmem:[%s1729_s6 + $0x50] sm:$0xff] %vm351_vm1, %v1031_v17 }
 0x1a8   : > { %v994_v20 = vpop.permute.xlu0 %993  ;;  %1082 = vst.msk [vmem:[%s1729_s6 + $0xc8] sm:$0xff] %vm351_vm1, %v1046_v19 }
 0x1a9   : > { %v1051_v21 = vmul.f32 %v994_v20, %v1680_v34  ;;  %v899_v22 = vpop.permute.xlu1 %898 }
 0x1aa   : > { %v1032_v24 = vmul.f32 %v899_v22, %v1677_v33 }
 0x1ab   : > { %1087 = vst.msk [vmem:[%s1729_s6 + $0xf0] sm:$0xff] %vm351_vm1, %v1051_v21 }
 0x1ac   : > { %v884_v25 = vpop.permute.xlu0 %883  ;;  %1068 = vst.msk [vmem:[%s1729_s6 + $0x58] sm:$0xff] %vm351_vm1, %v1032_v24 }
 0x1ad   : > { %v1029_v26 = vmul.f32 %v884_v25, %v1686_v36  ;;  %v999_v28 = vpop.permute.xlu1 %998 }
 0x1ae   : > { %v1052_v29 = vmul.f32 %v999_v28, %v1683_v35 }
 0x1af   : > { %1065 = vst.msk [vmem:[%s1729_s6 + $0x40] sm:$0xff] %vm351_vm1, %v1029_v26 }
 0x1b0   : > { %v984_v23 = vpop.permute.xlu0 %983  ;;  %1088 = vst.msk [vmem:[%s1729_s6 + $0xf8] sm:$0xff] %vm351_vm1, %v1052_v29 }
 0x1b1   : > { %v1049_v31 = vmul.f32 %v984_v23, %v1692_v30  ;;  %v889_v32 = vpop.permute.xlu1 %888 }
 0x1b2   : > { %v1030_v33 = vmul.f32 %v889_v32, %v1689_v37 }
 0x1b3   : > { %1085 = vst.msk [vmem:[%s1729_s6 + $0xe0] sm:$0xff] %vm351_vm1, %v1049_v31 }
 0x1b4   : > { %v914_v34 = vpop.permute.xlu0 %913  ;;  %1066 = vst.msk [vmem:[%s1729_s6 + $0x48] sm:$0xff] %vm351_vm1, %v1030_v33 }
 0x1b5   : > { %v1035_v36 = vmul.f32 %v914_v34, %v1698_v39  ;;  %v989_v35 = vpop.permute.xlu1 %988 }
 0x1b6   : > { %v1050_v16 = vmul.f32 %v989_v35, %v1695_v38 }
 0x1b7   : > { %1071 = vst.msk [vmem:[%s1729_s6 + $0x70] sm:$0xff] %vm351_vm1, %v1035_v36 }
 0x1b8   : > { %v904_v30 = vpop.permute.xlu0 %903  ;;  %1086 = vst.msk [vmem:[%s1729_s6 + $0xe8] sm:$0xff] %vm351_vm1, %v1050_v16 }
 0x1b9   : > { %v1033_v52 = vmul.f32 %v904_v30, %v1704_v41  ;;  %v919_v37 = vpop.permute.xlu1 %918 }
 0x1ba   : > { %v1036_v45 = vmul.f32 %v919_v37, %v1701_v40 }
 0x1bb   : > { %1069 = vst.msk [vmem:[%s1729_s6 + $0x60] sm:$0xff] %vm351_vm1, %v1033_v52 }
 0x1bc   : > { %v1004_v39 = vpop.permute.xlu0 %1003  ;;  %1072 = vst.msk [vmem:[%s1729_s6 + $0x78] sm:$0xff] %vm351_vm1, %v1036_v45 }
 0x1bd   : > { %v1053_v53 = vmul.f32 %v1004_v39, %v1710_v44  ;;  %v909_v38 = vpop.permute.xlu1 %908 }
 0x1be   : > { %v1034_v54 = vmul.f32 %v909_v38, %v1707_v43 }
 0x1bf   : > { %1089 = vst.msk [vmem:[%s1729_s6 + $0x100] sm:$0xff] %vm351_vm1, %v1053_v53 }
 0x1c0   : > { %v934_v41 = vpop.permute.xlu0 %933  ;;  %1070 = vst.msk [vmem:[%s1729_s6 + $0x68] sm:$0xff] %vm351_vm1, %v1034_v54 }
 0x1c1   : > { %v1039_v55 = vmul.f32 %v934_v41, %v1716_v42  ;;  %v1009_v40 = vpop.permute.xlu1 %1008 }
 0x1c2   : > { %v1054_v56 = vmul.f32 %v1009_v40, %v1713_v46 }
 0x1c3   : > { %1075 = vst.msk [vmem:[%s1729_s6 + $0x90] sm:$0xff] %vm351_vm1, %v1039_v55 }
 0x1c4   : > { %v924_v44 = vpop.permute.xlu0 %923  ;;  %1090 = vst.msk [vmem:[%s1729_s6 + $0x108] sm:$0xff] %vm351_vm1, %v1054_v56 }
 0x1c5   : > { %v1037_v57 = vmul.f32 %v924_v44, %v1722_v48  ;;  %v939_v43 = vpop.permute.xlu1 %938 }
 0x1c6   : > { %v1040_v58 = vmul.f32 %v939_v43, %v1719_v47 }
 0x1c7   : > { %1073 = vst.msk [vmem:[%s1729_s6 + $0x80] sm:$0xff] %vm351_vm1, %v1037_v57 }
 0x1c8   : > { %v1014_v42 = vpop.permute.xlu0 %1013  ;;  %1076 = vst.msk [vmem:[%s1729_s6 + $0x98] sm:$0xff] %vm351_vm1, %v1040_v58 }
 0x1c9   : > { %v1055_v27 = vmul.f32 %v1014_v42, %v1735_v50  ;;  %v929_v59 = vpop.permute.xlu1 %928 }
 0x1ca   : > { %v1038_v46 = vmul.f32 %v929_v59, %v1732_v49 }
 0x1cb   : > { %1091 = vst.msk [vmem:[%s1729_s6 + $0x110] sm:$0xff] %vm351_vm1, %v1055_v27 }
 0x1cc   : > { %1074 = vst.msk [vmem:[%s1729_s6 + $0x88] sm:$0xff] %vm351_vm1, %v1038_v46 }
 0x1cd   : > { %v1019_v48 = vpop.permute.xlu1 %1018 }
 0x1ce   : > { %v1056_v60 = vmul.f32 %v1019_v48, %v1738_v51 }
 0x1d0   : > { %1092 = vst.msk [vmem:[%s1729_s6 + $0x118] sm:$0xff] %vm351_vm1, %v1056_v60 }
 0x1d1 PF: > { %s13_s12 = sadd.s32 1, %s1504_s12  }
 0x1d2   : > { %p10_p4 = scmp.ge.s32.totalorder %s13_s12, 6  }
 0x1d4   :  { %12 = sbr.rel (!%p10_p4) target bundleno = 1 (0x1), region = 65 }

</bundles_post_ra>
